<compile_context>
chip_gen: v5e
topology: v5e:2x2
jax: 0.10.0
libtpu: 0.0.40
codegen_flags: <defaults>
</compile_context>

<pallas_src>
import functools
import math

import jax
import jax.numpy as jnp
import numpy as np
from jax import lax
from jax.experimental import pallas as pl
from jax.experimental.pallas import tpu as pltpu


def _layer_norm(x, w, b, eps):
    mu = jnp.mean(x, axis=-1, keepdims=True)
    var = jnp.mean(jnp.square(x - mu), axis=-1, keepdims=True)
    return (x - mu) * lax.rsqrt(var + eps) * w + b


def _gelu_exact(x):
    return 0.5 * x * (1.0 + lax.erf(x * (1.0 / math.sqrt(2.0))))


def albert_layer_kernel(xf_ref, mask_ref,
                        wq_ref, bq_ref, wkv_ref, bkv_ref,
                        wo_ref, bo_ref,
                        ln1_w_ref, ln1_b_ref, ln2_w_ref, ln2_b_ref,
                        w1_ref, b1_ref, w2_ref, b2_ref,
                        o_ref,
                        k_sc, v_sc,
                        *, num_heads, tq, ff_chunk, eps):
    f32 = jnp.float32
    cdt = wq_ref.dtype                                   # compute dtype (bf16)
    S, E = k_sc.shape
    Dh = E // num_heads
    q_idx = pl.program_id(1)

    # ---- K/V projection: computed once per batch element, cached in scratch ----
    @pl.when(q_idx == 0)
    def _():
        xf_c = xf_ref[0].astype(cdt)                                   # (S, E)
        kv = jnp.dot(xf_c, wkv_ref[...], preferred_element_type=f32) + bkv_ref[0]
        k_sc[...] = kv[:, :E].astype(cdt)
        v_sc[...] = kv[:, E:].astype(cdt)

    # ---- query tile sliced out of the VMEM-resident full sequence --------------
    row0 = pl.multiple_of(q_idx * tq, tq)
    x_q = xf_ref[0, pl.ds(row0, tq), :].astype(f32)                    # (TQ, E)

    # Additive key-padding mask, built once per tile (hoisted out of head loop).
    keep = mask_ref[0, 0].astype(f32)                                  # (S,)
    neg = ((1.0 - keep) * (-1e30)).reshape(1, S)

    # ---- attention --------------------------------------------------------------
    # 1/sqrt(Dh) is folded into wq/bq by the wrapper.
    q = jnp.dot(x_q.astype(cdt), wq_ref[...], preferred_element_type=f32) + bq_ref[0]
    q_c = q.astype(cdt)                       # single full-width cast, not per head
    k_c = k_sc[...]
    v_c = v_sc[...]

    # Per-head softmax(QK^T)V; contexts are lane-concatenated and sent through
    # ONE full-depth (TQ,E)@(E,E) out-projection matmul.
    # TODO(synk): for very large head counts a fori_loop over a head-major
    #             (H,S,Dh) layout would bound score live ranges further.
    ctx = []
    for h in range(num_heads):
        sl = slice(h * Dh, (h + 1) * Dh)
        s = lax.dot_general(q_c[:, sl], k_c[:, sl], (((1,), (1,)), ((), ())),
                            preferred_element_type=f32)               # (TQ, S)
        s = s + neg
        s = s - jnp.max(s, axis=-1, keepdims=True)
        p = jnp.exp(s)
        p = p * pl.reciprocal(jnp.sum(p, axis=-1, keepdims=True), approx=True)
        ctx.append(jnp.dot(p.astype(cdt), v_c[:, sl], preferred_element_type=f32))
    ctx = jnp.concatenate(ctx, axis=-1).astype(cdt)                    # (TQ, E)
    attn = jnp.dot(ctx, wo_ref[...], preferred_element_type=f32) + bo_ref[0]

    # ---- post-LN 1: attention.dense -> +residual -> attention.LayerNorm ---------
    y = _layer_norm(x_q + attn, ln1_w_ref[0], ln1_b_ref[0], eps)
    y_c = y.astype(cdt)

    # ---- feed-forward, hidden dim F tiled in static chunks ----------------------
    # TODO(synk): for ALBERT-xxlarge keep w1/w2 in HBM (memory_space=pl.ANY) and
    #             manually double-buffer the F-chunks instead of full residency.
    F = w1_ref.shape[1]
    ff = jnp.zeros((tq, E), f32)
    for c in range(F // ff_chunk):
        cs = slice(c * ff_chunk, (c + 1) * ff_chunk)
        hcol = jnp.dot(y_c, w1_ref[:, cs], preferred_element_type=f32) + b1_ref[0, cs]
        hcol = _gelu_exact(hcol)
        ff = ff + jnp.dot(hcol.astype(cdt), w2_ref[cs, :], preferred_element_type=f32)
    ff = ff + b2_ref[0]

    # ---- post-LN 2: ffn_output -> +residual -> full_layer_layer_norm ------------
    o_ref[0] = _layer_norm(y + ff, ln2_w_ref[0], ln2_b_ref[0], eps).astype(o_ref.dtype)


def _vmem_capacity_bytes():
    try:
        return int(pltpu.get_tpu_info().vmem_capacity_bytes)
    except Exception:
        return 128 * 1024 * 1024        # v5e / v6e default


def _pick_tq(S, cap_rows):
    for cand in (512, 256, 128):
        if cand <= cap_rows and S % cand == 0:
            return cand
    return S


def _pick_ff_chunk(F):
    for cand in (2048, 1536, 1024, 512, 256, 128):
        if F % cand == 0:
            return cand
    return F


def albert_layer(hidden, attention_mask, params, *, num_heads,
                 eps=1e-12, compute_dtype=jnp.bfloat16):
    """Run one ALBERT (BetterTransformer) encoder layer with a Pallas TPU kernel."""
    B, S, E = hidden.shape
    F = params["fc1_w"].shape[0]
    assert E % num_heads == 0
    Dh = E // num_heads
    scale = 1.0 / math.sqrt(Dh)
    f32 = jnp.float32

    # Wrapper-side weight prep: transpose once, fold 1/sqrt(Dh) into Q, fuse K/V
    # into one (E, 2E) projection, cast matmul weights to bf16 (biases/LN stay f32).
    in_w, in_b = params["in_w"], params["in_b"]
    wq_t = (in_w[:E] * scale).T.astype(compute_dtype)                # (E, E)
    wkv_t = in_w[E:].T.astype(compute_dtype)                         # (E, 2E) = [K | V]
    bq = (in_b[:E] * scale).astype(f32).reshape(1, E)
    bkv = in_b[E:].astype(f32).reshape(1, 2 * E)
    wo_t = params["out_w"].T.astype(compute_dtype)                   # (E, E)
    bo = params["out_b"].astype(f32).reshape(1, E)
    w1_t = params["fc1_w"].T.astype(compute_dtype)                   # (E, F)
    b1 = params["fc1_b"].astype(f32).reshape(1, F)
    w2_t = params["fc2_w"].T.astype(compute_dtype)                   # (F, E)
    b2 = params["fc2_b"].astype(f32).reshape(1, E)
    ln1_w = params["ln1_w"].astype(f32).reshape(1, E)
    ln1_b = params["ln1_b"].astype(f32).reshape(1, E)
    ln2_w = params["ln2_w"].astype(f32).reshape(1, E)
    ln2_b = params["ln2_b"].astype(f32).reshape(1, E)

    mask = attention_mask.reshape(B, 1, S).astype(f32)

    # Generation-aware tiling: smaller query tiles / VMEM budget on v7x (64 MiB),
    # bigger on v5e/v6e (128 MiB).
    vmem_cap = _vmem_capacity_bytes()
    tq = _pick_tq(S, 512 if vmem_cap >= 100 * 2**20 else 256)
    n_q = S // tq
    ff_chunk = _pick_ff_chunk(F)
    vmem_limit = min(96 * 2**20, int(vmem_cap * 0.625))

    # Constant operands (weights / biases / LN params): single-buffered.
    def _wspec(shape):
        return pl.BlockSpec(shape, lambda b, q: (0,) * len(shape),
                            pipeline_mode=pl.Buffered(1))

    kernel = functools.partial(albert_layer_kernel, num_heads=num_heads,
                               tq=tq, ff_chunk=ff_chunk, eps=eps)

    itemsize = jnp.dtype(hidden.dtype).itemsize
    wbytes = (E * E + 2 * E * E + E * E + 2 * E * F) * jnp.dtype(compute_dtype).itemsize
    cost = pl.CostEstimate(
        flops=int(B * (2 * S * E * 3 * E + 4 * S * S * E + 2 * S * E * E + 4 * S * E * F)),
        transcendentals=int(B * (num_heads * S * S + S * F)),
        bytes_accessed=int(2 * B * S * E * itemsize + B * S * 4 + wbytes),
    )

    return pl.pallas_call(
        kernel,
        out_shape=jax.ShapeDtypeStruct((B, S, E), hidden.dtype),
        grid_spec=pltpu.PrefetchScalarGridSpec(
            num_scalar_prefetch=0,
            grid=(B, n_q),
            in_specs=[
                pl.BlockSpec((1, S, E), lambda b, q: (b, 0, 0)),    # full seq (Q tiles + K/V src)
                pl.BlockSpec((1, 1, S), lambda b, q: (b, 0, 0)),    # key-padding mask
                _wspec((E, E)), _wspec((1, E)),                     # wq, bq (pre-scaled)
                _wspec((E, 2 * E)), _wspec((1, 2 * E)),             # fused wk|wv, bk|bv
                _wspec((E, E)), _wspec((1, E)),                     # out_proj
                _wspec((1, E)), _wspec((1, E)),                     # norm1
                _wspec((1, E)), _wspec((1, E)),                     # norm2
                _wspec((E, F)), _wspec((1, F)),                     # ffn (fc1)
                _wspec((F, E)), _wspec((1, E)),                     # ffn_output (fc2)
            ],
            out_specs=pl.BlockSpec((1, tq, E), lambda b, q: (b, q, 0)),
            scratch_shapes=[pltpu.VMEM((S, E), compute_dtype),      # cached K
                            pltpu.VMEM((S, E), compute_dtype)],     # cached V
        ),
        compiler_params=pltpu.CompilerParams(
            # batch axis parallel (megacore); q axis arbitrary (carries K/V scratch).
            dimension_semantics=("parallel", "arbitrary"),
            vmem_limit_bytes=vmem_limit,
        ),
        cost_estimate=cost,
    )(hidden, mask,
      wq_t, bq, wkv_t, bkv,
      wo_t, bo,
      ln1_w, ln1_b, ln2_w, ln2_b,
      w1_t, b1, w2_t, b2)


def reference_jax(hidden, attention_mask, p, *, num_heads, eps=1e-12):
    """Pure-JAX f32 reference of the ALBERT (post-LN) forward, for checking."""
    B, S, E = hidden.shape
    Dh = E // num_heads

    def ln(x, w, b):
        mu = x.mean(-1, keepdims=True)
        var = ((x - mu) ** 2).mean(-1, keepdims=True)
        return (x - mu) / jnp.sqrt(var + eps) * w + b

    qkv = hidden @ p["in_w"].T + p["in_b"]
    q, k, v = jnp.split(qkv, 3, axis=-1)
    q = q.reshape(B, S, num_heads, Dh).transpose(0, 2, 1, 3)
    k = k.reshape(B, S, num_heads, Dh).transpose(0, 2, 1, 3)
    v = v.reshape(B, S, num_heads, Dh).transpose(0, 2, 1, 3)
    scores = jnp.einsum("bhqd,bhkd->bhqk", q, k) / math.sqrt(Dh)
    keep = attention_mask.reshape(B, 1, 1, S)
    scores = scores + (1.0 - keep) * (-1e30)
    pa = jax.nn.softmax(scores, axis=-1)
    ctx = jnp.einsum("bhqk,bhkd->bhqd", pa, v).transpose(0, 2, 1, 3).reshape(B, S, E)
    x = ln(hidden + ctx @ p["out_w"].T + p["out_b"], p["ln1_w"], p["ln1_b"])
    f = jax.nn.gelu(x @ p["fc1_w"].T + p["fc1_b"], approximate=False)
    return ln(x + f @ p["fc2_w"].T + p["fc2_b"], p["ln2_w"], p["ln2_b"])


if __name__ == "__main__":
    B, S, E, H, F = 2, 8, 32, 4, 64

    key = jax.random.PRNGKey(0)
    ks = jax.random.split(key, 12)
    params = {
        "in_w":  0.05 * jax.random.normal(ks[0], (3 * E, E), jnp.float32),
        "in_b":  0.05 * jax.random.normal(ks[1], (3 * E,), jnp.float32),
        "out_w": 0.05 * jax.random.normal(ks[2], (E, E), jnp.float32),
        "out_b": 0.05 * jax.random.normal(ks[3], (E,), jnp.float32),
        "fc1_w": 0.05 * jax.random.normal(ks[4], (F, E), jnp.float32),
        "fc1_b": 0.05 * jax.random.normal(ks[5], (F,), jnp.float32),
        "fc2_w": 0.05 * jax.random.normal(ks[6], (E, F), jnp.float32),
        "fc2_b": 0.05 * jax.random.normal(ks[7], (E,), jnp.float32),
        "ln1_w": 1.0 + 0.01 * jax.random.normal(ks[8], (E,), jnp.float32),
        "ln1_b": 0.01 * jax.random.normal(ks[9], (E,), jnp.float32),
        "ln2_w": 1.0 + 0.01 * jax.random.normal(ks[10], (E,), jnp.float32),
        "ln2_b": 0.01 * jax.random.normal(ks[11], (E,), jnp.float32),
    }

    hidden = jax.random.normal(jax.random.PRNGKey(42), (B, S, E), jnp.float32)
    # batch 0: all tokens valid; batch 1: last two tokens padded
    mask = jnp.ones((B, S), jnp.float32).at[1, -2:].set(0.0)

    out = albert_layer(hidden, mask, params, num_heads=H, eps=1e-12)
    out = jax.block_until_ready(out)

    ref = reference_jax(hidden, mask, params, num_heads=H, eps=1e-12)
    # bf16 matmuls (f32 accumulation / stats) -> loose-ish tolerance vs f32 reference
    np.testing.assert_allclose(np.asarray(out), np.asarray(ref), rtol=3e-2, atol=3e-2)

    print("KERNEL_OK")
</pallas_src>

<mosaic_0001>
module attributes {stable_mosaic.version = 11 : i64} {
  func.func @albert_layer_kernel(%arg0: i32, %arg1: i32, %arg2: memref<1x8x32xf32, #tpu.memory_space<vmem>>, %arg3: memref<1x1x8xf32, #tpu.memory_space<vmem>>, %arg4: memref<32x32xbf16, #tpu.memory_space<vmem>>, %arg5: memref<1x32xf32, #tpu.memory_space<vmem>>, %arg6: memref<32x64xbf16, #tpu.memory_space<vmem>>, %arg7: memref<1x64xf32, #tpu.memory_space<vmem>>, %arg8: memref<32x32xbf16, #tpu.memory_space<vmem>>, %arg9: memref<1x32xf32, #tpu.memory_space<vmem>>, %arg10: memref<1x32xf32, #tpu.memory_space<vmem>>, %arg11: memref<1x32xf32, #tpu.memory_space<vmem>>, %arg12: memref<1x32xf32, #tpu.memory_space<vmem>>, %arg13: memref<1x32xf32, #tpu.memory_space<vmem>>, %arg14: memref<32x64xbf16, #tpu.memory_space<vmem>>, %arg15: memref<1x64xf32, #tpu.memory_space<vmem>>, %arg16: memref<64x32xbf16, #tpu.memory_space<vmem>>, %arg17: memref<1x32xf32, #tpu.memory_space<vmem>>, %arg18: memref<1x8x32xf32, #tpu.memory_space<vmem>>, %arg19: memref<8x32xbf16, #tpu.memory_space<vmem>>, %arg20: memref<8x32xbf16, #tpu.memory_space<vmem>>) attributes {dimension_semantics = [#tpu.dimension_semantics<parallel>, #tpu.dimension_semantics<arbitrary>], iteration_bounds = array<i64: 2, 1>, scalar_prefetch = 0 : i64, scratch_operands = 2 : i64, tpu.core_type = #tpu.core_type<tc>, window_params = [{transform_indices = @transform_0, window_bounds = array<i64: 1, 8, 32>}, {transform_indices = @transform_1, window_bounds = array<i64: 1, 1, 8>}, {pipeline_mode = #tpu.pipeline_mode<synchronous>, transform_indices = @transform_2, window_bounds = array<i64: 32, 32>}, {pipeline_mode = #tpu.pipeline_mode<synchronous>, transform_indices = @transform_3, window_bounds = array<i64: 1, 32>}, {pipeline_mode = #tpu.pipeline_mode<synchronous>, transform_indices = @transform_4, window_bounds = array<i64: 32, 64>}, {pipeline_mode = #tpu.pipeline_mode<synchronous>, transform_indices = @transform_5, window_bounds = array<i64: 1, 64>}, {pipeline_mode = #tpu.pipeline_mode<synchronous>, transform_indices = @transform_6, window_bounds = array<i64: 32, 32>}, {pipeline_mode = #tpu.pipeline_mode<synchronous>, transform_indices = @transform_7, window_bounds = array<i64: 1, 32>}, {pipeline_mode = #tpu.pipeline_mode<synchronous>, transform_indices = @transform_8, window_bounds = array<i64: 1, 32>}, {pipeline_mode = #tpu.pipeline_mode<synchronous>, transform_indices = @transform_9, window_bounds = array<i64: 1, 32>}, {pipeline_mode = #tpu.pipeline_mode<synchronous>, transform_indices = @transform_10, window_bounds = array<i64: 1, 32>}, {pipeline_mode = #tpu.pipeline_mode<synchronous>, transform_indices = @transform_11, window_bounds = array<i64: 1, 32>}, {pipeline_mode = #tpu.pipeline_mode<synchronous>, transform_indices = @transform_12, window_bounds = array<i64: 32, 64>}, {pipeline_mode = #tpu.pipeline_mode<synchronous>, transform_indices = @transform_13, window_bounds = array<i64: 1, 64>}, {pipeline_mode = #tpu.pipeline_mode<synchronous>, transform_indices = @transform_14, window_bounds = array<i64: 64, 32>}, {pipeline_mode = #tpu.pipeline_mode<synchronous>, transform_indices = @transform_15, window_bounds = array<i64: 1, 32>}, {transform_indices = @transform_16, window_bounds = array<i64: 1, 8, 32>}]} {
    %c0_i32 = arith.constant 0 : i32
    %0 = arith.cmpi eq, %arg1, %c0_i32 : i32
    %1 = arith.extui %0 : i1 to i32
    %c0_i32_0 = arith.constant 0 : i32
    %2 = arith.cmpi ne, %1, %c0_i32_0 : i32
    scf.if %2 {
      %c0_71 = arith.constant 0 : index
      %c0_72 = arith.constant 0 : index
      %c0_73 = arith.constant 0 : index
      %194 = vector.load %arg2[%c0_71, %c0_72, %c0_73] : memref<1x8x32xf32, #tpu.memory_space<vmem>>, vector<1x8x32xf32>
      %195 = vector.shape_cast %194 : vector<1x8x32xf32> to vector<8x32xf32>
      %196 = arith.truncf %195 : vector<8x32xf32> to vector<8x32xbf16>
      %c0_74 = arith.constant 0 : index
      %c0_75 = arith.constant 0 : index
      %197 = vector.load %arg6[%c0_74, %c0_75] : memref<32x64xbf16, #tpu.memory_space<vmem>>, vector<32x64xbf16>
      %cst_76 = arith.constant dense<0.000000e+00> : vector<8x64xf32>
      %198 = tpu.matmul %196, %197, %cst_76 {dimension_numbers = #tpu.dot_dimension_numbers<[1], [0], [0], [1], [0, 0, 1, 1], [], []>} : vector<8x32xbf16>, vector<32x64xbf16>, vector<8x64xf32> -> vector<8x64xf32>
      %c0_77 = arith.constant 0 : index
      %c0_78 = arith.constant 0 : index
      %199 = vector.load %arg7[%c0_77, %c0_78] : memref<1x64xf32, #tpu.memory_space<vmem>>, vector<1x64xf32>
      %200 = vector.shape_cast %199 : vector<1x64xf32> to vector<64xf32>
      %201 = vector.shape_cast %200 : vector<64xf32> to vector<1x64xf32>
      %202 = vector.broadcast %201 : vector<1x64xf32> to vector<8x64xf32>
      %203 = arith.addf %198, %202 : vector<8x64xf32>
      %204 = vector.extract_strided_slice %203 {offsets = [0, 0], sizes = [8, 32], strides = [1, 1]} : vector<8x64xf32> to vector<8x32xf32>
      %205 = arith.truncf %204 : vector<8x32xf32> to vector<8x32xbf16>
      %c0_79 = arith.constant 0 : index
      %c0_80 = arith.constant 0 : index
      %206 = vector.load %arg19[%c0_79, %c0_80] : memref<8x32xbf16, #tpu.memory_space<vmem>>, vector<8x32xbf16>
      tpu.vector_store %arg19[%c0_79, %c0_80], %205 {strides = array<i32>} : memref<8x32xbf16, #tpu.memory_space<vmem>>, vector<8x32xbf16>,
      %207 = vector.extract_strided_slice %203 {offsets = [0, 32], sizes = [8, 32], strides = [1, 1]} : vector<8x64xf32> to vector<8x32xf32>
      %208 = arith.truncf %207 : vector<8x32xf32> to vector<8x32xbf16>
      %c0_81 = arith.constant 0 : index
      %c0_82 = arith.constant 0 : index
      %209 = vector.load %arg20[%c0_81, %c0_82] : memref<8x32xbf16, #tpu.memory_space<vmem>>, vector<8x32xbf16>
      tpu.vector_store %arg20[%c0_81, %c0_82], %208 {strides = array<i32>} : memref<8x32xbf16, #tpu.memory_space<vmem>>, vector<8x32xbf16>,
    } else {
    }
    %c8_i32 = arith.constant 8 : i32
    %3 = arith.muli %arg1, %c8_i32 : i32
    %4 = tpu.assume_multiple %3, 8 : i32
    %c0 = arith.constant 0 : index
    %5 = arith.index_cast %4 : i32 to index
    %c0_1 = arith.constant 0 : index
    %6 = vector.load %arg2[%c0, %5, %c0_1] : memref<1x8x32xf32, #tpu.memory_space<vmem>>, vector<1x8x32xf32>
    %7 = vector.shape_cast %6 : vector<1x8x32xf32> to vector<8x32xf32>
    %c0_2 = arith.constant 0 : index
    %c0_3 = arith.constant 0 : index
    %c0_4 = arith.constant 0 : index
    %8 = vector.load %arg3[%c0_2, %c0_3, %c0_4] : memref<1x1x8xf32, #tpu.memory_space<vmem>>, vector<1x1x8xf32>
    %9 = vector.shape_cast %8 : vector<1x1x8xf32> to vector<8xf32>
    %cst = arith.constant 1.000000e+00 : f32
    %10 = vector.broadcast %cst : f32 to vector<8xf32>
    %11 = arith.subf %10, %9 : vector<8xf32>
    %cst_5 = arith.constant -1.000000e+30 : f32
    %12 = vector.broadcast %cst_5 : f32 to vector<8xf32>
    %13 = arith.mulf %11, %12 : vector<8xf32>
    %14 = vector.shape_cast %13 : vector<8xf32> to vector<1x8xf32>
    %15 = arith.truncf %7 : vector<8x32xf32> to vector<8x32xbf16>
    %c0_6 = arith.constant 0 : index
    %c0_7 = arith.constant 0 : index
    %16 = vector.load %arg4[%c0_6, %c0_7] : memref<32x32xbf16, #tpu.memory_space<vmem>>, vector<32x32xbf16>
    %cst_8 = arith.constant dense<0.000000e+00> : vector<8x32xf32>
    %17 = tpu.matmul %15, %16, %cst_8 {dimension_numbers = #tpu.dot_dimension_numbers<[1], [0], [0], [1], [0, 0, 1, 1], [], []>} : vector<8x32xbf16>, vector<32x32xbf16>, vector<8x32xf32> -> vector<8x32xf32>
    %c0_9 = arith.constant 0 : index
    %c0_10 = arith.constant 0 : index
    %18 = vector.load %arg5[%c0_9, %c0_10] : memref<1x32xf32, #tpu.memory_space<vmem>>, vector<1x32xf32>
    %19 = vector.shape_cast %18 : vector<1x32xf32> to vector<32xf32>
    %20 = vector.shape_cast %19 : vector<32xf32> to vector<1x32xf32>
    %21 = vector.broadcast %20 : vector<1x32xf32> to vector<8x32xf32>
    %22 = arith.addf %17, %21 : vector<8x32xf32>
    %23 = arith.truncf %22 : vector<8x32xf32> to vector<8x32xbf16>
    %c0_11 = arith.constant 0 : index
    %c0_12 = arith.constant 0 : index
    %24 = vector.load %arg19[%c0_11, %c0_12] : memref<8x32xbf16, #tpu.memory_space<vmem>>, vector<8x32xbf16>
    %c0_13 = arith.constant 0 : index
    %c0_14 = arith.constant 0 : index
    %25 = vector.load %arg20[%c0_13, %c0_14] : memref<8x32xbf16, #tpu.memory_space<vmem>>, vector<8x32xbf16>
    %26 = vector.extract_strided_slice %23 {offsets = [0, 0], sizes = [8, 8], strides = [1, 1]} : vector<8x32xbf16> to vector<8x8xbf16>
    %27 = vector.extract_strided_slice %24 {offsets = [0, 0], sizes = [8, 8], strides = [1, 1]} : vector<8x32xbf16> to vector<8x8xbf16>
    %cst_15 = arith.constant dense<0.000000e+00> : vector<8x8xf32>
    %28 = tpu.matmul %26, %27, %cst_15 {dimension_numbers = #tpu.dot_dimension_numbers<[1], [1], [0], [0], [0, 0, 1, 0], [], []>} : vector<8x8xbf16>, vector<8x8xbf16>, vector<8x8xf32> -> vector<8x8xf32>
    %29 = vector.broadcast %14 : vector<1x8xf32> to vector<8x8xf32>
    %30 = arith.addf %28, %29 : vector<8x8xf32>
    %cst_16 = arith.constant dense<0xFF800000> : vector<8xf32>
    %31 = vector.multi_reduction <maximumf>, %30, %cst_16 [1] : vector<8x8xf32> to vector<8xf32>
    %32 = vector.shape_cast %31 : vector<8xf32> to vector<8x1xf32>
    %33 = vector.broadcast %32 : vector<8x1xf32> to vector<8x8xf32>
    %34 = arith.subf %30, %33 : vector<8x8xf32>
    %35 = math.exp %34 : vector<8x8xf32>
    %cst_17 = arith.constant dense<0.000000e+00> : vector<8xf32>
    %36 = vector.multi_reduction <add>, %35, %cst_17 [1] : vector<8x8xf32> to vector<8xf32>
    %37 = vector.shape_cast %36 : vector<8xf32> to vector<8x1xf32>
    %38 = tpu.reciprocal %37 {approx = true} : vector<8x1xf32> -> vector<8x1xf32>
    %39 = vector.broadcast %38 : vector<8x1xf32> to vector<8x8xf32>
    %40 = arith.mulf %35, %39 : vector<8x8xf32>
    %41 = arith.truncf %40 : vector<8x8xf32> to vector<8x8xbf16>
    %42 = vector.extract_strided_slice %25 {offsets = [0, 0], sizes = [8, 8], strides = [1, 1]} : vector<8x32xbf16> to vector<8x8xbf16>
    %cst_18 = arith.constant dense<0.000000e+00> : vector<8x8xf32>
    %43 = tpu.matmul %41, %42, %cst_18 {dimension_numbers = #tpu.dot_dimension_numbers<[1], [0], [0], [1], [0, 0, 1, 1], [], []>} : vector<8x8xbf16>, vector<8x8xbf16>, vector<8x8xf32> -> vector<8x8xf32>
    %44 = vector.extract_strided_slice %23 {offsets = [0, 8], sizes = [8, 8], strides = [1, 1]} : vector<8x32xbf16> to vector<8x8xbf16>
    %45 = vector.extract_strided_slice %24 {offsets = [0, 8], sizes = [8, 8], strides = [1, 1]} : vector<8x32xbf16> to vector<8x8xbf16>
    %cst_19 = arith.constant dense<0.000000e+00> : vector<8x8xf32>
    %46 = tpu.matmul %44, %45, %cst_19 {dimension_numbers = #tpu.dot_dimension_numbers<[1], [1], [0], [0], [0, 0, 1, 0], [], []>} : vector<8x8xbf16>, vector<8x8xbf16>, vector<8x8xf32> -> vector<8x8xf32>
    %47 = vector.broadcast %14 : vector<1x8xf32> to vector<8x8xf32>
    %48 = arith.addf %46, %47 : vector<8x8xf32>
    %cst_20 = arith.constant dense<0xFF800000> : vector<8xf32>
    %49 = vector.multi_reduction <maximumf>, %48, %cst_20 [1] : vector<8x8xf32> to vector<8xf32>
    %50 = vector.shape_cast %49 : vector<8xf32> to vector<8x1xf32>
    %51 = vector.broadcast %50 : vector<8x1xf32> to vector<8x8xf32>
    %52 = arith.subf %48, %51 : vector<8x8xf32>
    %53 = math.exp %52 : vector<8x8xf32>
    %cst_21 = arith.constant dense<0.000000e+00> : vector<8xf32>
    %54 = vector.multi_reduction <add>, %53, %cst_21 [1] : vector<8x8xf32> to vector<8xf32>
    %55 = vector.shape_cast %54 : vector<8xf32> to vector<8x1xf32>
    %56 = tpu.reciprocal %55 {approx = true} : vector<8x1xf32> -> vector<8x1xf32>
    %57 = vector.broadcast %56 : vector<8x1xf32> to vector<8x8xf32>
    %58 = arith.mulf %53, %57 : vector<8x8xf32>
    %59 = arith.truncf %58 : vector<8x8xf32> to vector<8x8xbf16>
    %60 = vector.extract_strided_slice %25 {offsets = [0, 8], sizes = [8, 8], strides = [1, 1]} : vector<8x32xbf16> to vector<8x8xbf16>
    %cst_22 = arith.constant dense<0.000000e+00> : vector<8x8xf32>
    %61 = tpu.matmul %59, %60, %cst_22 {dimension_numbers = #tpu.dot_dimension_numbers<[1], [0], [0], [1], [0, 0, 1, 1], [], []>} : vector<8x8xbf16>, vector<8x8xbf16>, vector<8x8xf32> -> vector<8x8xf32>
    %62 = vector.extract_strided_slice %23 {offsets = [0, 16], sizes = [8, 8], strides = [1, 1]} : vector<8x32xbf16> to vector<8x8xbf16>
    %63 = vector.extract_strided_slice %24 {offsets = [0, 16], sizes = [8, 8], strides = [1, 1]} : vector<8x32xbf16> to vector<8x8xbf16>
    %cst_23 = arith.constant dense<0.000000e+00> : vector<8x8xf32>
    %64 = tpu.matmul %62, %63, %cst_23 {dimension_numbers = #tpu.dot_dimension_numbers<[1], [1], [0], [0], [0, 0, 1, 0], [], []>} : vector<8x8xbf16>, vector<8x8xbf16>, vector<8x8xf32> -> vector<8x8xf32>
    %65 = vector.broadcast %14 : vector<1x8xf32> to vector<8x8xf32>
    %66 = arith.addf %64, %65 : vector<8x8xf32>
    %cst_24 = arith.constant dense<0xFF800000> : vector<8xf32>
    %67 = vector.multi_reduction <maximumf>, %66, %cst_24 [1] : vector<8x8xf32> to vector<8xf32>
    %68 = vector.shape_cast %67 : vector<8xf32> to vector<8x1xf32>
    %69 = vector.broadcast %68 : vector<8x1xf32> to vector<8x8xf32>
    %70 = arith.subf %66, %69 : vector<8x8xf32>
    %71 = math.exp %70 : vector<8x8xf32>
    %cst_25 = arith.constant dense<0.000000e+00> : vector<8xf32>
    %72 = vector.multi_reduction <add>, %71, %cst_25 [1] : vector<8x8xf32> to vector<8xf32>
    %73 = vector.shape_cast %72 : vector<8xf32> to vector<8x1xf32>
    %74 = tpu.reciprocal %73 {approx = true} : vector<8x1xf32> -> vector<8x1xf32>
    %75 = vector.broadcast %74 : vector<8x1xf32> to vector<8x8xf32>
    %76 = arith.mulf %71, %75 : vector<8x8xf32>
    %77 = arith.truncf %76 : vector<8x8xf32> to vector<8x8xbf16>
    %78 = vector.extract_strided_slice %25 {offsets = [0, 16], sizes = [8, 8], strides = [1, 1]} : vector<8x32xbf16> to vector<8x8xbf16>
    %cst_26 = arith.constant dense<0.000000e+00> : vector<8x8xf32>
    %79 = tpu.matmul %77, %78, %cst_26 {dimension_numbers = #tpu.dot_dimension_numbers<[1], [0], [0], [1], [0, 0, 1, 1], [], []>} : vector<8x8xbf16>, vector<8x8xbf16>, vector<8x8xf32> -> vector<8x8xf32>
    %80 = vector.extract_strided_slice %23 {offsets = [0, 24], sizes = [8, 8], strides = [1, 1]} : vector<8x32xbf16> to vector<8x8xbf16>
    %81 = vector.extract_strided_slice %24 {offsets = [0, 24], sizes = [8, 8], strides = [1, 1]} : vector<8x32xbf16> to vector<8x8xbf16>
    %cst_27 = arith.constant dense<0.000000e+00> : vector<8x8xf32>
    %82 = tpu.matmul %80, %81, %cst_27 {dimension_numbers = #tpu.dot_dimension_numbers<[1], [1], [0], [0], [0, 0, 1, 0], [], []>} : vector<8x8xbf16>, vector<8x8xbf16>, vector<8x8xf32> -> vector<8x8xf32>
    %83 = vector.broadcast %14 : vector<1x8xf32> to vector<8x8xf32>
    %84 = arith.addf %82, %83 : vector<8x8xf32>
    %cst_28 = arith.constant dense<0xFF800000> : vector<8xf32>
    %85 = vector.multi_reduction <maximumf>, %84, %cst_28 [1] : vector<8x8xf32> to vector<8xf32>
    %86 = vector.shape_cast %85 : vector<8xf32> to vector<8x1xf32>
    %87 = vector.broadcast %86 : vector<8x1xf32> to vector<8x8xf32>
    %88 = arith.subf %84, %87 : vector<8x8xf32>
    %89 = math.exp %88 : vector<8x8xf32>
    %cst_29 = arith.constant dense<0.000000e+00> : vector<8xf32>
    %90 = vector.multi_reduction <add>, %89, %cst_29 [1] : vector<8x8xf32> to vector<8xf32>
    %91 = vector.shape_cast %90 : vector<8xf32> to vector<8x1xf32>
    %92 = tpu.reciprocal %91 {approx = true} : vector<8x1xf32> -> vector<8x1xf32>
    %93 = vector.broadcast %92 : vector<8x1xf32> to vector<8x8xf32>
    %94 = arith.mulf %89, %93 : vector<8x8xf32>
    %95 = arith.truncf %94 : vector<8x8xf32> to vector<8x8xbf16>
    %96 = vector.extract_strided_slice %25 {offsets = [0, 24], sizes = [8, 8], strides = [1, 1]} : vector<8x32xbf16> to vector<8x8xbf16>
    %cst_30 = arith.constant dense<0.000000e+00> : vector<8x8xf32>
    %97 = tpu.matmul %95, %96, %cst_30 {dimension_numbers = #tpu.dot_dimension_numbers<[1], [0], [0], [1], [0, 0, 1, 1], [], []>} : vector<8x8xbf16>, vector<8x8xbf16>, vector<8x8xf32> -> vector<8x8xf32>
    %98 = tpu.concatenate %43, %61, %79, %97 in 1 : vector<8x8xf32>, vector<8x8xf32>, vector<8x8xf32>, vector<8x8xf32> -> vector<8x32xf32>
    %99 = arith.truncf %98 : vector<8x32xf32> to vector<8x32xbf16>
    %c0_31 = arith.constant 0 : index
    %c0_32 = arith.constant 0 : index
    %100 = vector.load %arg8[%c0_31, %c0_32] : memref<32x32xbf16, #tpu.memory_space<vmem>>, vector<32x32xbf16>
    %cst_33 = arith.constant dense<0.000000e+00> : vector<8x32xf32>
    %101 = tpu.matmul %99, %100, %cst_33 {dimension_numbers = #tpu.dot_dimension_numbers<[1], [0], [0], [1], [0, 0, 1, 1], [], []>} : vector<8x32xbf16>, vector<32x32xbf16>, vector<8x32xf32> -> vector<8x32xf32>
    %c0_34 = arith.constant 0 : index
    %c0_35 = arith.constant 0 : index
    %102 = vector.load %arg9[%c0_34, %c0_35] : memref<1x32xf32, #tpu.memory_space<vmem>>, vector<1x32xf32>
    %103 = vector.shape_cast %102 : vector<1x32xf32> to vector<32xf32>
    %104 = vector.shape_cast %103 : vector<32xf32> to vector<1x32xf32>
    %105 = vector.broadcast %104 : vector<1x32xf32> to vector<8x32xf32>
    %106 = arith.addf %101, %105 : vector<8x32xf32>
    %107 = arith.addf %7, %106 : vector<8x32xf32>
    %c0_36 = arith.constant 0 : index
    %c0_37 = arith.constant 0 : index
    %108 = vector.load %arg10[%c0_36, %c0_37] : memref<1x32xf32, #tpu.memory_space<vmem>>, vector<1x32xf32>
    %109 = vector.shape_cast %108 : vector<1x32xf32> to vector<32xf32>
    %c0_38 = arith.constant 0 : index
    %c0_39 = arith.constant 0 : index
    %110 = vector.load %arg11[%c0_38, %c0_39] : memref<1x32xf32, #tpu.memory_space<vmem>>, vector<1x32xf32>
    %111 = vector.shape_cast %110 : vector<1x32xf32> to vector<32xf32>
    %cst_40 = arith.constant dense<0.000000e+00> : vector<8xf32>
    %112 = vector.multi_reduction <add>, %107, %cst_40 [1] : vector<8x32xf32> to vector<8xf32>
    %113 = vector.shape_cast %112 : vector<8xf32> to vector<8x1xf32>
    %cst_41 = arith.constant 3.200000e+01 : f32
    %114 = vector.broadcast %cst_41 : f32 to vector<8x1xf32>
    %115 = arith.divf %113, %114 : vector<8x1xf32>
    %116 = vector.broadcast %115 : vector<8x1xf32> to vector<8x32xf32>
    %117 = arith.subf %107, %116 : vector<8x32xf32>
    %118 = arith.mulf %117, %117 : vector<8x32xf32>
    %cst_42 = arith.constant dense<0.000000e+00> : vector<8xf32>
    %119 = vector.multi_reduction <add>, %118, %cst_42 [1] : vector<8x32xf32> to vector<8xf32>
    %120 = vector.shape_cast %119 : vector<8xf32> to vector<8x1xf32>
    %cst_43 = arith.constant 3.200000e+01 : f32
    %121 = vector.broadcast %cst_43 : f32 to vector<8x1xf32>
    %122 = arith.divf %120, %121 : vector<8x1xf32>
    %123 = vector.broadcast %115 : vector<8x1xf32> to vector<8x32xf32>
    %124 = arith.subf %107, %123 : vector<8x32xf32>
    %cst_44 = arith.constant 9.99999996E-13 : f32
    %125 = vector.broadcast %cst_44 : f32 to vector<8x1xf32>
    %126 = arith.addf %122, %125 : vector<8x1xf32>
    %127 = math.rsqrt %126 : vector<8x1xf32>
    %128 = vector.broadcast %127 : vector<8x1xf32> to vector<8x32xf32>
    %129 = arith.mulf %124, %128 : vector<8x32xf32>
    %130 = vector.shape_cast %109 : vector<32xf32> to vector<1x32xf32>
    %131 = vector.broadcast %130 : vector<1x32xf32> to vector<8x32xf32>
    %132 = arith.mulf %129, %131 : vector<8x32xf32>
    %133 = vector.shape_cast %111 : vector<32xf32> to vector<1x32xf32>
    %134 = vector.broadcast %133 : vector<1x32xf32> to vector<8x32xf32>
    %135 = arith.addf %132, %134 : vector<8x32xf32>
    %136 = arith.truncf %135 : vector<8x32xf32> to vector<8x32xbf16>
    %cst_45 = arith.constant 0.000000e+00 : f32
    %137 = vector.broadcast %cst_45 : f32 to vector<8x32xf32>
    %c0_46 = arith.constant 0 : index
    %c0_47 = arith.constant 0 : index
    %138 = vector.load %arg14[%c0_46, %c0_47] : memref<32x64xbf16, #tpu.memory_space<vmem>>, vector<32x64xbf16>
    %cst_48 = arith.constant dense<0.000000e+00> : vector<8x64xf32>
    %139 = tpu.matmul %136, %138, %cst_48 {dimension_numbers = #tpu.dot_dimension_numbers<[1], [0], [0], [1], [0, 0, 1, 1], [], []>} : vector<8x32xbf16>, vector<32x64xbf16>, vector<8x64xf32> -> vector<8x64xf32>
    %c0_49 = arith.constant 0 : index
    %c0_50 = arith.constant 0 : index
    %140 = vector.load %arg15[%c0_49, %c0_50] : memref<1x64xf32, #tpu.memory_space<vmem>>, vector<1x64xf32>
    %141 = vector.shape_cast %140 : vector<1x64xf32> to vector<64xf32>
    %142 = vector.shape_cast %141 : vector<64xf32> to vector<1x64xf32>
    %143 = vector.broadcast %142 : vector<1x64xf32> to vector<8x64xf32>
    %144 = arith.addf %139, %143 : vector<8x64xf32>
    %cst_51 = arith.constant 5.000000e-01 : f32
    %145 = vector.broadcast %cst_51 : f32 to vector<8x64xf32>
    %146 = arith.mulf %145, %144 : vector<8x64xf32>
    %cst_52 = arith.constant 0.707106769 : f32
    %147 = vector.broadcast %cst_52 : f32 to vector<8x64xf32>
    %148 = arith.mulf %144, %147 : vector<8x64xf32>
    %149 = math.erf %148 : vector<8x64xf32>
    %cst_53 = arith.constant 1.000000e+00 : f32
    %150 = vector.broadcast %cst_53 : f32 to vector<8x64xf32>
    %151 = arith.addf %150, %149 : vector<8x64xf32>
    %152 = arith.mulf %146, %151 : vector<8x64xf32>
    %153 = arith.truncf %152 : vector<8x64xf32> to vector<8x64xbf16>
    %c0_54 = arith.constant 0 : index
    %c0_55 = arith.constant 0 : index
    %154 = vector.load %arg16[%c0_54, %c0_55] : memref<64x32xbf16, #tpu.memory_space<vmem>>, vector<64x32xbf16>
    %cst_56 = arith.constant dense<0.000000e+00> : vector<8x32xf32>
    %155 = tpu.matmul %153, %154, %cst_56 {dimension_numbers = #tpu.dot_dimension_numbers<[1], [0], [0], [1], [0, 0, 1, 1], [], []>} : vector<8x64xbf16>, vector<64x32xbf16>, vector<8x32xf32> -> vector<8x32xf32>
    %156 = arith.addf %137, %155 : vector<8x32xf32>
    %c0_57 = arith.constant 0 : index
    %c0_58 = arith.constant 0 : index
    %157 = vector.load %arg17[%c0_57, %c0_58] : memref<1x32xf32, #tpu.memory_space<vmem>>, vector<1x32xf32>
    %158 = vector.shape_cast %157 : vector<1x32xf32> to vector<32xf32>
    %159 = vector.shape_cast %158 : vector<32xf32> to vector<1x32xf32>
    %160 = vector.broadcast %159 : vector<1x32xf32> to vector<8x32xf32>
    %161 = arith.addf %156, %160 : vector<8x32xf32>
    %162 = arith.addf %135, %161 : vector<8x32xf32>
    %c0_59 = arith.constant 0 : index
    %c0_60 = arith.constant 0 : index
    %163 = vector.load %arg12[%c0_59, %c0_60] : memref<1x32xf32, #tpu.memory_space<vmem>>, vector<1x32xf32>
    %164 = vector.shape_cast %163 : vector<1x32xf32> to vector<32xf32>
    %c0_61 = arith.constant 0 : index
    %c0_62 = arith.constant 0 : index
    %165 = vector.load %arg13[%c0_61, %c0_62] : memref<1x32xf32, #tpu.memory_space<vmem>>, vector<1x32xf32>
    %166 = vector.shape_cast %165 : vector<1x32xf32> to vector<32xf32>
    %cst_63 = arith.constant dense<0.000000e+00> : vector<8xf32>
    %167 = vector.multi_reduction <add>, %162, %cst_63 [1] : vector<8x32xf32> to vector<8xf32>
    %168 = vector.shape_cast %167 : vector<8xf32> to vector<8x1xf32>
    %cst_64 = arith.constant 3.200000e+01 : f32
    %169 = vector.broadcast %cst_64 : f32 to vector<8x1xf32>
    %170 = arith.divf %168, %169 : vector<8x1xf32>
    %171 = vector.broadcast %170 : vector<8x1xf32> to vector<8x32xf32>
    %172 = arith.subf %162, %171 : vector<8x32xf32>
    %173 = arith.mulf %172, %172 : vector<8x32xf32>
    %cst_65 = arith.constant dense<0.000000e+00> : vector<8xf32>
    %174 = vector.multi_reduction <add>, %173, %cst_65 [1] : vector<8x32xf32> to vector<8xf32>
    %175 = vector.shape_cast %174 : vector<8xf32> to vector<8x1xf32>
    %cst_66 = arith.constant 3.200000e+01 : f32
    %176 = vector.broadcast %cst_66 : f32 to vector<8x1xf32>
    %177 = arith.divf %175, %176 : vector<8x1xf32>
    %178 = vector.broadcast %170 : vector<8x1xf32> to vector<8x32xf32>
    %179 = arith.subf %162, %178 : vector<8x32xf32>
    %cst_67 = arith.constant 9.99999996E-13 : f32
    %180 = vector.broadcast %cst_67 : f32 to vector<8x1xf32>
    %181 = arith.addf %177, %180 : vector<8x1xf32>
    %182 = math.rsqrt %181 : vector<8x1xf32>
    %183 = vector.broadcast %182 : vector<8x1xf32> to vector<8x32xf32>
    %184 = arith.mulf %179, %183 : vector<8x32xf32>
    %185 = vector.shape_cast %164 : vector<32xf32> to vector<1x32xf32>
    %186 = vector.broadcast %185 : vector<1x32xf32> to vector<8x32xf32>
    %187 = arith.mulf %184, %186 : vector<8x32xf32>
    %188 = vector.shape_cast %166 : vector<32xf32> to vector<1x32xf32>
    %189 = vector.broadcast %188 : vector<1x32xf32> to vector<8x32xf32>
    %190 = arith.addf %187, %189 : vector<8x32xf32>
    %c0_68 = arith.constant 0 : index
    %c0_69 = arith.constant 0 : index
    %c0_70 = arith.constant 0 : index
    %191 = vector.load %arg18[%c0_68, %c0_69, %c0_70] : memref<1x8x32xf32, #tpu.memory_space<vmem>>, vector<1x8x32xf32>
    %192 = vector.shape_cast %191 : vector<1x8x32xf32> to vector<8x32xf32>
    %193 = vector.shape_cast %190 : vector<8x32xf32> to vector<1x8x32xf32>
    tpu.vector_store %arg18[%c0_68, %c0_69, %c0_70], %193 {strides = array<i32>} : memref<1x8x32xf32, #tpu.memory_space<vmem>>, vector<1x8x32xf32>,
    return
  }
  func.func @transform_0(%arg0: i32, %arg1: i32) -> (i32, i32, i32) {
    %c0_i32 = arith.constant 0 : i32
    %c0_i32_0 = arith.constant 0 : i32
    %c0_i32_1 = arith.constant 0 : i32
    return %arg0, %c0_i32, %c0_i32_0 : i32, i32, i32
  }
  func.func @transform_1(%arg0: i32, %arg1: i32) -> (i32, i32, i32) {
    %c0_i32 = arith.constant 0 : i32
    %c0_i32_0 = arith.constant 0 : i32
    %c0_i32_1 = arith.constant 0 : i32
    return %arg0, %c0_i32, %c0_i32_0 : i32, i32, i32
  }
  func.func @transform_2(%arg0: i32, %arg1: i32) -> (i32, i32) {
    %c0_i32 = arith.constant 0 : i32
    %c0_i32_0 = arith.constant 0 : i32
    %c0_i32_1 = arith.constant 0 : i32
    return %c0_i32, %c0_i32_0 : i32, i32
  }
  func.func @transform_3(%arg0: i32, %arg1: i32) -> (i32, i32) {
    %c0_i32 = arith.constant 0 : i32
    %c0_i32_0 = arith.constant 0 : i32
    %c0_i32_1 = arith.constant 0 : i32
    return %c0_i32, %c0_i32_0 : i32, i32
  }
  func.func @transform_4(%arg0: i32, %arg1: i32) -> (i32, i32) {
    %c0_i32 = arith.constant 0 : i32
    %c0_i32_0 = arith.constant 0 : i32
    %c0_i32_1 = arith.constant 0 : i32
    return %c0_i32, %c0_i32_0 : i32, i32
  }
  func.func @transform_5(%arg0: i32, %arg1: i32) -> (i32, i32) {
    %c0_i32 = arith.constant 0 : i32
    %c0_i32_0 = arith.constant 0 : i32
    %c0_i32_1 = arith.constant 0 : i32
    return %c0_i32, %c0_i32_0 : i32, i32
  }
  func.func @transform_6(%arg0: i32, %arg1: i32) -> (i32, i32) {
    %c0_i32 = arith.constant 0 : i32
    %c0_i32_0 = arith.constant 0 : i32
    %c0_i32_1 = arith.constant 0 : i32
    return %c0_i32, %c0_i32_0 : i32, i32
  }
  func.func @transform_7(%arg0: i32, %arg1: i32) -> (i32, i32) {
    %c0_i32 = arith.constant 0 : i32
    %c0_i32_0 = arith.constant 0 : i32
    %c0_i32_1 = arith.constant 0 : i32
    return %c0_i32, %c0_i32_0 : i32, i32
  }
  func.func @transform_8(%arg0: i32, %arg1: i32) -> (i32, i32) {
    %c0_i32 = arith.constant 0 : i32
    %c0_i32_0 = arith.constant 0 : i32
    %c0_i32_1 = arith.constant 0 : i32
    return %c0_i32, %c0_i32_0 : i32, i32
  }
  func.func @transform_9(%arg0: i32, %arg1: i32) -> (i32, i32) {
    %c0_i32 = arith.constant 0 : i32
    %c0_i32_0 = arith.constant 0 : i32
    %c0_i32_1 = arith.constant 0 : i32
    return %c0_i32, %c0_i32_0 : i32, i32
  }
  func.func @transform_10(%arg0: i32, %arg1: i32) -> (i32, i32) {
    %c0_i32 = arith.constant 0 : i32
    %c0_i32_0 = arith.constant 0 : i32
    %c0_i32_1 = arith.constant 0 : i32
    return %c0_i32, %c0_i32_0 : i32, i32
  }
  func.func @transform_11(%arg0: i32, %arg1: i32) -> (i32, i32) {
    %c0_i32 = arith.constant 0 : i32
    %c0_i32_0 = arith.constant 0 : i32
    %c0_i32_1 = arith.constant 0 : i32
    return %c0_i32, %c0_i32_0 : i32, i32
  }
  func.func @transform_12(%arg0: i32, %arg1: i32) -> (i32, i32) {
    %c0_i32 = arith.constant 0 : i32
    %c0_i32_0 = arith.constant 0 : i32
    %c0_i32_1 = arith.constant 0 : i32
    return %c0_i32, %c0_i32_0 : i32, i32
  }
  func.func @transform_13(%arg0: i32, %arg1: i32) -> (i32, i32) {
    %c0_i32 = arith.constant 0 : i32
    %c0_i32_0 = arith.constant 0 : i32
    %c0_i32_1 = arith.constant 0 : i32
    return %c0_i32, %c0_i32_0 : i32, i32
  }
  func.func @transform_14(%arg0: i32, %arg1: i32) -> (i32, i32) {
    %c0_i32 = arith.constant 0 : i32
    %c0_i32_0 = arith.constant 0 : i32
    %c0_i32_1 = arith.constant 0 : i32
    return %c0_i32, %c0_i32_0 : i32, i32
  }
  func.func @transform_15(%arg0: i32, %arg1: i32) -> (i32, i32) {
    %c0_i32 = arith.constant 0 : i32
    %c0_i32_0 = arith.constant 0 : i32
    %c0_i32_1 = arith.constant 0 : i32
    return %c0_i32, %c0_i32_0 : i32, i32
  }
  func.func @transform_16(%arg0: i32, %arg1: i32) -> (i32, i32, i32) {
    %c0_i32 = arith.constant 0 : i32
    %c0_i32_0 = arith.constant 0 : i32
    return %arg0, %arg1, %c0_i32 : i32, i32, i32
  }
}

</mosaic_0001>

<bundles_post_ra>
// kernel: tpu_custom_call.1
= control target key start
LH: loop header
LB: loop body
LE: loop exit
PB: predicated region body
PF: predicated region fallthrough
CT: control target
= control target key end

     0   :  { %s2081_s0 = inlined_call_operand.vmem [shape: f32[2,8,32], index: 0, kind: input, shape index: {}]   ;;  %s2082_s1 = inlined_call_operand.hbm [shape: f32[2,1,8], index: 1, kind: input, shape index: {}]   ;;  %s2083_s2 = inlined_call_operand.vmem [shape: bf16[32,32], index: 2, kind: input, shape index: {}]   ;;  %s2084_s3 = inlined_call_operand.vmem [shape: f32[1,32], index: 3, kind: input, shape index: {}]   ;;  %s2085_s4 = inlined_call_operand.vmem [shape: bf16[32,64], index: 4, kind: input, shape index: {}]   ;;  %s2086_s5 = inlined_call_operand.vmem [shape: f32[1,64], index: 5, kind: input, shape index: {}]   ;;  %s2087_s6 = inlined_call_operand.hbm [shape: bf16[32,32], index: 6, kind: input, shape index: {}]   ;;  %s2088_s7 = inlined_call_operand.vmem [shape: f32[1,32], index: 7, kind: input, shape index: {}]   ;;  %s2089_s8 = inlined_call_operand.vmem [shape: f32[1,32], index: 8, kind: input, shape index: {}]   ;;  %s2090_s9 = inlined_call_operand.vmem [shape: f32[1,32], index: 9, kind: input, shape index: {}]   ;;  %s2091_s10 = inlined_call_operand.vmem [shape: f32[1,32], index: 10, kind: input, shape index: {}]   ;;  %s2092_s11 = inlined_call_operand.vmem [shape: f32[1,32], index: 11, kind: input, shape index: {}]   ;;  %s2093_s12 = inlined_call_operand.hbm [shape: bf16[32,64], index: 12, kind: input, shape index: {}]   ;;  %s2094_s13 = inlined_call_operand.vmem [shape: f32[1,64], index: 13, kind: input, shape index: {}]   ;;  %s2095_s14 = inlined_call_operand.vmem [shape: bf16[64,32], index: 14, kind: input, shape index: {}]   ;;  %s2096_s15 = inlined_call_operand.vmem [shape: f32[1,32], index: 15, kind: input, shape index: {}]   ;;  %s2097_s16 = inlined_call_operand.hbm [shape: f32[2,8,32], index: 16, kind: output, shape index: {}]  }
   0x1   :  { %2103 = sst [smem:[#allocation17_spill]] %s2081_s0 }
   0x2   :  { %2104 = sst [smem:[#allocation18_spill]] %s2082_s1 }
   0x3   :  { %2105 = sst [smem:[#allocation19_spill]] %s2087_s6 }
   0x4   :  { %2106 = sst [smem:[#allocation20_spill]] %s2091_s10 }
   0x5   :  { %2107 = sst [smem:[#allocation21_spill]] %s2092_s11 }
   0x6   :  { %2108 = sst [smem:[#allocation22_spill]] %s2093_s12 }
   0x7   :  { %2109 = sst [smem:[#allocation23_spill]] %s2096_s15 }
   0x8   :  { %2110 = sst [smem:[#allocation24_spill]] %s2097_s16 }
   0x9   :  { %21 = vsyncpa [#allocation5], 0 }
   0xa   :  { %23 = vsyncpa [#allocation5 + $0x1], 0 }
   0xb   :  { %24 = vsyncpa [#allocation8], 0 }
   0xc   :  { %25 = vsyncpa [#allocation6], 0 }
   0xd   :  { %27 = vsyncpa [#allocation6 + $0x1], 0  ;;  %s1808_s21 = smov 0   ;;  %s1810_s22 = smov 0  }
   0xe   :  { %s1812_s23 = smov 0   ;;  %s1814_s24 = smov 0  }
   0xf   :  { %s1816_s25 = smov 0   ;;  %s1818_s26 = smov 0  }
  0x10 LB: > { %2111 = sst [smem:[#allocation14_spill]] %s1689_s21  ;;  %s2098_s27 = sadd.s32 4294967295, %s1709_s26   ;;  %s1709_s26 = sphi %s1818_s26, %s33_s26   ;;  %s1705_s25 = sphi %s1816_s25, %s2132_s25   ;;  %s1701_s24 = sphi %s1814_s24, %s2131_s24   ;;  %s1697_s23 = sphi %s1812_s23, %s2135_s23   ;;  %s1693_s22 = sphi %s1810_s22, %s2134_s22   ;;  %s1689_s21 = sphi %s1808_s21, %s2133_s21  }
  0x11   : > { %2112 = sst [smem:[#allocation15_spill]] %s1705_s25  ;;  %p1320_p0 = scmp.ge.s32.totalorder %s1709_s26, 1 }
  0x12   : > { %p1842_p1 = scmp.eq.s32.totalorder %s2098_s27, 0  ;;  %p424_p2 = scmp.lt.s32.totalorder %s1709_s26, 3 }
  0x13   : > { %s2114_s6 = sld [smem:[#allocation19_spill]]  ;;  %s1711_s18 = smov [#allocation7]  }
  0x14   : > { %p1850_p3 = pnand %p1320_p0, %p424_p2  ;;  %s449_s19 = sshll.u32 %s1711_s18, 4  ;;  %s450_s19 = int_to_ptr.vmem [resolvable:$true] %s449_s19 }
  0x15   : > { %p1323_p6 = scmp.ge.s32.totalorder %s1709_s26, 2  ;;  %s2116_s12 = sld [smem:[#allocation22_spill]] }
  0x16   : > { %p1419_p4 = pneg %p1850_p3  ;;  %s1712_s27 = smov 64  }
  0x17   : > { %s1714_s18 = smov [#allocation9]   ;;  %s1319_s16 = sadd.s32 4294967294, %s1709_s26  }
  0x18   : > { %p1420_p5 = pnand %p1419_p4, %p1842_p1  ;;  %s478_s11 = sshll.u32 %s1714_s18, 4  ;;  %s479_s11 = int_to_ptr.vmem [resolvable:$true] %s478_s11 }
  0x19   : > { %s447_s0 = sshll.u32 %s2114_s6, 4  ;;  %s1713_s6 = smov 4   ;;  %s448_s0 = int_to_ptr.hbm [resolvable:$true] %s447_s0 }
  0x1a   : > { %1422 = dma.hbm_to_vmem [thread:$0]  (!%p1420_p5), %s448_s0, 256, %s450_s19, [#allocation8], %s1712_s27, %s1712_s27, %s1713_s6  }
  0x1b   : > { %s476_s30 = sshll.u32 %s2116_s12, 4  ;;  %s45_s10 = sadd.s32 1, %s1705_s25  ;;  %s477_s30 = int_to_ptr.hbm [resolvable:$true] %s476_s30 }
  0x1c   : > { %1425 = dma.hbm_to_vmem [thread:$0]  (!%p1420_p5), %s477_s30, 256, %s479_s11, [#allocation8], %s1712_s27, %s1712_s27, %s1713_s6  }
  0x1d   : > { %p47_p7 = scmp.ge.s32.totalorder %s45_s10, 2  ;;  %s78_s20 = sadd.s32 1, %s1697_s23 }
  0x1e   : > { %p85_p8 = scmp.ne.s32.totalorder %s1697_s23, %s1693_s22  ;;  %p86_p9 = scmp.eq.s32.totalorder %s1709_s26, 0 }
  0x1f   : > { %s2137_s10 = smov (%p47_p7, %s45_s10), 0  ;;  %p91_p11 = scmp.ne.s32.totalorder %s1693_s22, %s1689_s21 }
  0x20   : > { %2117 = sst [smem:[#allocation16_spill]] %s2137_s10  ;;  %p1870_p10 = por %p86_p9, %p85_p8 }
  0x21   : > { %s75_s19 = ssub.s32 %s1705_s25, %s2137_s10  ;;  %s2119_s6 = sadd.s32 4294967295, %s1709_s26  }
  0x22   : > { %p411_p12 = scmp.eq.s32.totalorder %s2119_s6, 1  ;;  %p76_p13 = scmp.eq.s32.totalorder %s75_s19, 0 }
  0x23   : > { %p1882_p0 = por %p1842_p1, %p91_p11  ;;  %p417_p4 = scmp.eq.s32.totalorder %s1319_s16, 1 }
  0x24   : > { %p1886_p2 = por %p411_p12, %p85_p8  ;;  %p1436_p7 = scmp.lt.s32.totalorder %s1709_s26, 2 }
  0x25   : > { %s1891_s29 = scalar_select %p76_p13, %s1697_s23, %s78_s20  }
  0x26   : > { %p1893_p5 = por %p417_p4, %p91_p11  ;;  %s508_s18 = sand.u32 1, %s1697_s23  }
  0x27   : > { %s2123_s1 = sld [smem:[#allocation18_spill]]  ;;  %s511_s21 = scalar_lea.vmem [#allocation4], %s508_s18 }
  0x28   : > { %s518_s15 = sshll.u32 %s511_s21, 4  ;;  %p1427_p8 = pnand %p1436_p7, %p1870_p10  ;;  %s519_s15 = int_to_ptr.vmem [resolvable:$true] %s518_s15 }
  0x29   : > { %s509_s16 = scalar_lea.sflag [#allocation5], %s508_s18  ;;  %s1908_s20 = sand.u32 (!%p1850_p3), 1, %s1693_s22  }
  0x2a   : > { %s530_s6 = scalar_lea.sflag (!%p1850_p3), [#allocation5], %s1908_s20 }
  0x2b   : > { %527 = sbr.rel (%p1850_p3) target bundleno = 2263 (0x8d7), region = 84 }
  0x2d   : > { %s514_s12 = scalar_lea.hbm %s2123_s1, %s1705_s25 }
  0x2e   : > { %s516_s10 = sshll.u32 %s514_s12, 4  ;;  %s517_s10 = int_to_ptr.hbm [resolvable:$true] %s516_s10 }
  0x2f   : > { %1429 = dma.hbm_to_vmem [thread:$0]  (!%p1427_p8), %s517_s10, 16, %s519_s15, %s509_s16  }
  0x30   : > { %1676 = dma.done.wait (%p1882_p0), %s530_s6, 16  }
  0x31   : > { %1678 = vsyncadd (%p1882_p0), %s530_s6, 4294967280 }
  0x32   : > { %1680 = dma.done.wait (%p1842_p1), [#allocation8], 512  }
  0x33   : > { %1682 = vsyncadd (%p1842_p1), [#allocation8], 4294966784  ;;  %p595_p3 = scmp.lt.s32.totalorder %s1701_s24, 1  ;;  %s2124_s17 = sld [smem:[#allocation17_spill]]  ;;  %v1396_v0 = vld [vmem:[%s2085_s4 + $0x8] sm:$0xff]  ;;  %v1395_v2 = vld [vmem:[%s2085_s4] sm:$0xff] }
  0x34   : > { %v1398_v1 = vld [vmem:[%s2083_s2 + $0x8] sm:$0xff]  ;;  %v1397_v3 = vld [vmem:[%s2083_s2] sm:$0xff]  ;;  %636 = vmatpush.bf16.msra.mxu0 %v1396_v0  ;;  %vm626_vm0 = vcmask 261120   ;;  %vm644_vm1 = vcmask 257024   ;;  %vm701_vm2 = vcmask 64512   ;;  %s1716_s15 = smov 112  }
  0x35   : > { %s596_s10 = scalar_select %p595_p3, %s1701_s24, 1  ;;  %688 = vmatpush.bf16.msra.mxu1 %v1398_v1  ;;  %v1500_v6 = vld [vmem:[%s2086_s5] ss:$0 sm:$0xff]  ;;  %vm736_vm3 = vcmask 1043456   ;;  %vm943_vm4 = vcmask 130048   ;;  %vm945_vm5 = vcmask 195584  }
  0x36   : > { %v1501_v7 = vld [vmem:[%s2084_s3] ss:$0 sm:$0xff]  ;;  %s1717_s21 = smov 104   ;;  %s1719_s18 = smov 16   ;;  %vm1142_vm14 = vcmask 523264  }
  0x37   : > { %s1328_s12 = sshll.u32 %s596_s10, 3  ;;  %s1720_s16 = smov 8  }
  0x38   : > { %637 = vmatpush.bf16.msra.mxu0 %v1395_v2  ;;  %s1721_s11 = smov 24   ;;  %s2126_s1 = sld [smem:[#allocation23_spill]] }
  0x39   : > { %s598_s0 = scalar_lea.vmem %s2124_s17, %s1328_s12  ;;  %689 = vmatpush.bf16.msra.mxu1 %v1397_v3  ;;  %s1715_s12 = smov 120  }
  0x3a   : > { %v1937_v4 = vld [vmem:[%s598_s0] sm:$0xff]  ;;  %s2125_s17 = scalar_lea.vmem [#allocation4], %s1908_s20  ;;  %s1718_s0 = smov 96  }
  0x3b   : > { %v605_v5 = vpack.c.bf16 %v1937_v4, %v1937_v4  ;;  %v654_v27 = vld [vmem:[%s2125_s17] sm:$0x1]  ;;  %s1327_s25 = sshll.u32 %s1908_s20, 3  ;;  %s2127_s17 = sld [smem:[#allocation20_spill]] }
  0x3c   : > { %v655_v28 = vsub.f32 1.0, %v654_v27  ;;  %s2129_s19 = sld [smem:[#allocation21_spill]] }
  0x3d   : > { %1337 = vmatmul.msk.bf16.vlgmr.msra.gmra.mxu0 %vm626_vm0, %v605_v5  ;;  %1346 = vmatmul.msk.bf16.vlgmr.msra.gmra.mxu1 %vm626_vm0, %v605_v5 }
  0x3e   : > { %v656_v29 = vmul.f32 -1e+30, %v655_v28 }
  0x40   : > { %v699_v30 = vperm.slane %v656_v29, 0 }
  0xba   : > { %v639_v8 = vpop.f32.mrf.mxu0  ;;  %v691_v9 = vpop.f32.mrf.mxu1 }
  0xbb   : > { %v640_v10 = vadd.f32 %v1500_v6, %v639_v8  ;;  %v692_v11 = vadd.f32 %v1501_v7, %v691_v9 }
  0xbd   : > { %v643_v12 = vpack.c.bf16 %v640_v10, %v640_v10  ;;  %v695_v13 = vpack.c.bf16 %v692_v11, %v692_v11 }
  0xbf   : > { %645 = vst.msk [vmem:[#allocation2] sm:$0xf] %vm644_vm1, %v643_v12  ;;  %v754_v14 = vunpack.c.l.b16 %v695_v13 }
  0xc1   : > { %v755_v15 = vpack.c.b16 %v754_v14, %v754_v14 }
  0xc2   : > { %v641_v16 = vpop.f32.mrf.mxu0  ;;  %v693_v17 = vpop.f32.mrf.mxu1 }
  0xc3   : > { %756 = vrot.lane.b32.xlu2 %v755_v15, %s1715_s12 }
  0xc6   : > { %v696_v18 = vld [vmem:[#allocation2] sm:$0xf] }
  0xc7   : > { %v706_v19 = vsel %vm701_vm2, %v696_v18, 0  ;;  %v759_v20 = vunpack.c.l.b16 %v696_v18 }
  0xc8   : > { %715 = vmatpush.bf16.xpose.msra.mxu2 %v706_v19 }
  0xc9   : > { %v760_v21 = vpack.c.b16 %v759_v20, %v759_v20 }
  0xcb   : > { %820 = vrot.lane.b32.xlu2 %v760_v21, %s1716_s15 }
  0xcf   : > { %1347 = vmatmul.msk.bf16.vlgmr.msra.gmra.mxu2 %vm701_vm2, %v695_v13 }
  0xd3   : > { %876 = vrot.lane.b32.xlu2 %v760_v21, %s1717_s21 }
  0xdb   : > { %818 = vrot.lane.b32.xlu2 %v755_v15, %s1716_s15 }
 0x11d   : > { %v757_v22 = vpop.permute.xlu2 %756 }
 0x125   : > { %v821_v23 = vpop.permute.xlu2 %820 }
 0x126   : > { %v826_v24 = vsel %vm701_vm2, %v821_v23, 0 }
 0x127   : > { %835 = vmatpush.bf16.xpose.msrb.mxu1 %v826_v24 }
 0x12d   : > { %v877_v25 = vpop.permute.xlu2 %876 }
 0x12e   : > { %v882_v55 = vsel %vm701_vm2, %v877_v25, 0 }
 0x135   : > { %v819_v26 = vpop.permute.xlu2 %818 }
 0x136   : > { %1351 = vmatmul.msk.bf16.vlgmr.msrb.gmra.mxu1 %vm701_vm2, %v819_v26 }
 0x152   : > { %v717_v31 = vpop.f32.mrf.mxu2 }
 0x153   : > { %v718_v32 = vadd.f32 %v717_v31, %v699_v30 }
 0x155   : > { %v721_v33 = vsel %vm701_vm2, %v718_v32, -inf }
 0x156   : > { %722 = vmax.xlane.f32.xlu0 %v721_v33 }
 0x15a   : > { %v719_v34 = vpop.f32.mrf.mxu2 }
 0x16a   : > { %647 = vrot.lane.b32.xlu0 %v643_v12, %s1718_s0 }
 0x172   : > { %874 = vrot.lane.b32.xlu0 %v755_v15, %s1717_s21 }
 0x1b3   : > { %v837_v35 = vpop.f32.mrf.mxu1 }
 0x1b4   : > { %v838_v45 = vadd.f32 %v837_v35, %v699_v30 }
 0x1b6   : > { %v841_v46 = vsel %vm701_vm2, %v838_v45, -inf }
 0x1bb   : > { %v839_v36 = vpop.f32.mrf.mxu1 }
 0x1c9   : > { %v723_v37 = vpop.xlane.xlu0 %722 }
 0x1ca   : > { %v724_v38 = vsub.f32 %v718_v32, %v723_v37 }
 0x1cc   : > { %v725_v39 = vmul.f32 1.442695, %v724_v38 }
 0x1ce   : > { %1509 = vpow2.f32 %v725_v39 }
 0x1d4   : > { %v1510_v40 = vpop.eup %1509 }
 0x1d5   : > { %v727_v41 = vsel %vm701_vm2, %v1510_v40, 0.0 }
 0x1d6   : > { %728 = vadd.xlane.f32.xlu1 %v727_v41 }
 0x1dc   : > { %v648_v42 = vpop.permute.xlu0 %647 }
 0x1dd   : > { %650 = vst.msk [vmem:[#allocation3] sm:$0xf] %vm644_vm1, %v648_v42 }
 0x1e4   : > { %v697_v43 = vld [vmem:[#allocation3] sm:$0xf]  ;;  %v875_v56 = vpop.permute.xlu0 %874 }
 0x1e5   : > { %v738_v44 = vsel %vm736_vm3, %v697_v43, 0  ;;  %v795_v47 = vunpack.c.l.b16 %v697_v43  ;;  %v1400_v43 = vld [vmem:[#allocation7 + $0x8] sm:$0xff] }
 0x1e6   : > { %747 = vmatpush.bf16.msra.mxu3 %v738_v44  ;;  %977 = vmatpush.bf16.msra.mxu1 %v1400_v43  ;;  %v1399_v44 = vld [vmem:[#allocation7] sm:$0xff] }
 0x1e7   : > { %v796_v48 = vpack.c.b16 %v795_v47, %v795_v47 }
 0x1ea   : > { %978 = vmatpush.bf16.msra.mxu1 %v1399_v44 }
 0x1ef   : > { %761 = vrot.lane.b32.xlu1 %v760_v21, %s1715_s12 }
 0x219   : > { %842 = vmax.xlane.f32.xlu1 %v841_v46 }
 0x232   : > { %797 = vrot.lane.b32.xlu1 %v796_v48, %s1715_s12  ;;  %s1392_s12 = sshll.u32 %s1701_s24, 3  ;;  %s594_s24 = scalar_lea.vmem [#allocation10], %s1327_s25 }
 0x233   : > { %s1207_s10 = sshll.u32 %s594_s24, 4  ;;  %s1208_s10 = int_to_ptr.vmem [resolvable:$true] %s1207_s10 }
 0x249   : > { %v729_v49 = vpop.xlane.xlu1 %728 }
 0x24a   : > { %1511 = vrcp.f32 %v729_v49 }
 0x250   : > { %v1512_v50 = vpop.eup %1511 }
 0x251   : > { %v731_v51 = vmul.f32 %v1512_v50, %v1510_v40 }
 0x253   : > { %v732_v52 = vpack.c.bf16 %v731_v51, %v731_v51 }
 0x255   : > { %1348 = vmatmul.msk.bf16.vlgmr.msra.gmra.mxu3 %vm701_vm2, %v732_v52  ;;  %v1502_v52 = vld [vmem:[%s2088_s7] ss:$0 sm:$0xff] }
 0x261   : > { %v762_v53 = vpop.permute.xlu1 %761 }
 0x262   : > { %v767_v54 = vsel %vm701_vm2, %v762_v53, 0 }
 0x263   : > { %776 = vmatpush.bf16.xpose.msrb.mxu3 %v767_v54 }
 0x26a   : > { %1349 = vmatmul.msk.bf16.vlgmr.msrb.gmra.mxu3 %vm701_vm2, %v757_v22 }
 0x26b   : > { %891 = vmatpush.bf16.xpose.msra.mxu3 %v882_v55 }
 0x27a   : > { %1353 = vmatmul.msk.bf16.vlgmr.msra.gmra.mxu3 %vm701_vm2, %v875_v56 }
 0x28c   : > { %v843_v57 = vpop.xlane.xlu1 %842 }
 0x28d   : > { %v844_v2 = vsub.f32 %v838_v45, %v843_v57 }
 0x28f   : > { %v845_v3 = vmul.f32 1.442695, %v844_v2 }
 0x291   : > { %1513 = vpow2.f32 %v845_v3 }
 0x297   : > { %v1514_v8 = vpop.eup %1513 }
 0x298   : > { %v847_v10 = vsel %vm701_vm2, %v1514_v8, 0.0 }
 0x2a4   : > { %v798_v58 = vpop.permute.xlu1 %797 }
 0x2a5   : > { %v803_v59 = vsel %vm736_vm3, %v798_v58, 0  ;;  %v1722_v58 = vmov 32.0  }
 0x2a6   : > { %812 = vmatpush.bf16.msrb.mxu0 %v803_v59 }
 0x2d8   : > { %v1974_v60 = vpop.f32.mrf.mxu3 }
 0x2e0   : > { %v751_v61 = vpop.f32.mrf.mxu3 }
 0x2ed   : > { %v778_v62 = vpop.f32.mrf.mxu3 }
 0x2ee   : > { %v779_v63 = vadd.f32 %v778_v62, %v699_v30 }
 0x2f0   : > { %v782_v0 = vsel %vm701_vm2, %v779_v63, -inf }
 0x2f1   : > { %783 = vmax.xlane.f32.xlu2 %v782_v0 }
 0x2f5   : > { %v780_v1 = vpop.f32.mrf.mxu3 }
 0x2fd   : > { %v893_v5 = vpop.f32.mrf.mxu3 }
 0x2fe   : > { %v894_v6 = vadd.f32 %v893_v5, %v699_v30 }
 0x300   : > { %v897_v7 = vsel %vm701_vm2, %v894_v6, -inf }
 0x301   : > { %898 = vmax.xlane.f32.xlu0 %v897_v7  ;;  %v1401_v7 = vld [vmem:[#allocation9] sm:$0xff] }
 0x305   : > { %v895_v9 = vpop.f32.mrf.mxu3 }
 0x309   : > { %848 = vadd.xlane.f32.xlu0 %v847_v10 }
 0x31d   : > { %853 = vrot.lane.b32.xlu0 %v796_v48, %s1716_s15  ;;  %s1194_s15 = scalar_lea.sflag [#allocation6], %s1908_s20 }
 0x364   : > { %v784_v11 = vpop.xlane.xlu2 %783 }
 0x365   : > { %v785_v12 = vsub.f32 %v779_v63, %v784_v11 }
 0x367   : > { %v786_v13 = vmul.f32 1.442695, %v785_v12 }
 0x369   : > { %1515 = vpow2.f32 %v786_v13 }
 0x36f   : > { %v1516_v14 = vpop.eup %1515 }
 0x370   : > { %v788_v15 = vsel %vm701_vm2, %v1516_v14, 0.0 }
 0x371   : > { %789 = vadd.xlane.f32.xlu2 %v788_v15 }
 0x374   : > { %v899_v16 = vpop.xlane.xlu0 %898 }
 0x375   : > { %v900_v17 = vsub.f32 %v894_v6, %v899_v16  ;;  %v1402_v6 = vld [vmem:[#allocation9 + $0x8] sm:$0xff] }
 0x377   : > { %v901_v18 = vmul.f32 1.442695, %v900_v17  ;;  %v1503_v17 = vld [vmem:[%s2089_s8] ss:$0 sm:$0xff] }
 0x379   : > { %1517 = vpow2.f32 %v901_v18 }
 0x37c   : > { %v849_v21 = vpop.xlane.xlu0 %848 }
 0x37d   : > { %1519 = vrcp.f32 %v849_v21 }
 0x37f   : > { %v1518_v19 = vpop.eup %1517 }
 0x380   : > { %v903_v20 = vsel %vm701_vm2, %v1518_v19, 0.0 }
 0x381   : > { %904 = vadd.xlane.f32.xlu2 %v903_v20 }
 0x383   : > { %v1520_v22 = vpop.eup %1519 }
 0x384   : > { %v851_v23 = vmul.f32 %v1520_v22, %v1514_v8 }
 0x386   : > { %v852_v26 = vpack.c.bf16 %v851_v23, %v851_v23 }
 0x38f   : > { %v854_v24 = vpop.permute.xlu0 %853 }
 0x390   : > { %v859_v25 = vsel %vm736_vm3, %v854_v24, 0  ;;  %v1505_v24 = vld [vmem:[%s2094_s13] ss:$0 sm:$0xff] }
 0x391   : > { %868 = vmatpush.bf16.msrb.mxu2 %v859_v25 }
 0x394   : > { %1352 = vmatmul.msk.bf16.vlgmr.msrb.gmra.mxu2 %vm701_vm2, %v852_v26 }
 0x395   : > { %1054 = vmatpush.bf16.msra.mxu2 %v1402_v6 }
 0x399   : > { %909 = vrot.lane.b32.xlu2 %v796_v48, %s1717_s21  ;;  %1055 = vmatpush.bf16.msra.mxu2 %v1401_v7 }
 0x3e4   : > { %v790_v27 = vpop.xlane.xlu2 %789 }
 0x3e5   : > { %1521 = vrcp.f32 %v790_v27 }
 0x3eb   : > { %v1522_v28 = vpop.eup %1521 }
 0x3ec   : > { %v792_v29 = vmul.f32 %v1522_v28, %v1516_v14 }
 0x3ee   : > { %v793_v30 = vpack.c.bf16 %v792_v29, %v792_v29 }
 0x3f0   : > { %1350 = vmatmul.msk.bf16.vlgmr.msrb.gmra.mxu0 %vm701_vm2, %v793_v30 }
 0x3f4   : > { %v905_v31 = vpop.xlane.xlu2 %904 }
 0x3f5   : > { %1523 = vrcp.f32 %v905_v31  ;;  %v1406_v31 = vld [vmem:[%s2095_s14 + $0x18] sm:$0xff] }
 0x3f6   : > { %1525 = vrcp.f32 %v1722_v58  ;;  %1150 = vmatpush.bf16.msrb.mxu3 %v1406_v31  ;;  %v1508_v31 = vld [vmem:[%s2129_s19] ss:$0 sm:$0xff] }
 0x3fb   : > { %v1524_v32 = vpop.eup %1523 }
 0x3fc   : > { %v907_v33 = vmul.f32 %v1524_v32, %v1518_v19  ;;  %v910_v34 = vpop.permute.xlu2 %909  ;;  %v1526_v59 = vpop.eup %1525  ;;  %v1504_v19 = vld [vmem:[%s2090_s9] ss:$0 sm:$0xff] }
 0x3fd   : > { %v915_v35 = vsel %vm736_vm3, %v910_v34, 0  ;;  %vm995_vm6 = vweird.f32 %v1526_v59 }
 0x3fe   : > { %v908_v36 = vpack.c.bf16 %v907_v33, %v907_v33  ;;  %924 = vmatpush.bf16.msra.mxu0 %v915_v35 }
 0x401   : > { %1354 = vmatmul.msk.bf16.vlgmr.msra.gmra.mxu0 %vm701_vm2, %v908_v36  ;;  %v1405_v36 = vld [vmem:[%s2095_s14 + $0x10] sm:$0xff] }
 0x402   : > { %1151 = vmatpush.bf16.msrb.mxu3 %v1405_v36 }
 0x417   : > { %v870_v37 = vpop.f32.mrf.mxu2 }
 0x418   : > { %935 = vrot.lane.b32.xlu0 %v870_v37, %s1719_s18 }
 0x41f   : > { %v872_v38 = vpop.f32.mrf.mxu2 }
 0x46d   : > { %v814_v39 = vpop.f32.mrf.mxu0 }
 0x46e   : > { %931 = vrot.lane.b32.xlu1 %v814_v39, %s1720_s16  ;;  %s2128_s16 = sld [smem:[#allocation24_spill]] }
 0x474   : > { %s1643_s25 = scalar_lea.hbm %s2128_s16, 16 }
 0x475   : > { %v816_v40 = vpop.f32.mrf.mxu0 }
 0x47e   : > { %v926_v41 = vpop.f32.mrf.mxu0 }
 0x47f   : > { %939 = vrot.lane.b32.xlu1 %v926_v41, %s1721_s11  ;;  %v1404_v41 = vld [vmem:[%s2095_s14 + $0x8] sm:$0xff]  ;;  %s1205_s11 = scalar_lea.hbm %s2128_s16, %s1392_s12 }
 0x480   : > { %1152 = vmatpush.bf16.msrb.mxu3 %v1404_v41 }
 0x486   : > { %v928_v42 = vpop.f32.mrf.mxu0 }
 0x48a   : > { %v936_v47 = vpop.permute.xlu0 %935 }
 0x4e0   : > { %v932_v45 = vpop.permute.xlu1 %931 }
 0x4e1   : > { %v942_v46 = vsel %vm701_vm2, %v1974_v60, %v932_v45  ;;  %v991_v60 = vmul.f32 32.0, %v1526_v59  ;;  %v1403_v45 = vld [vmem:[%s2095_s14] sm:$0xff] }
 0x4e2   : > { %v944_v49 = vsel %vm943_vm4, %v942_v46, %v936_v47  ;;  %1153 = vmatpush.bf16.msrb.mxu3 %v1403_v45 }
 0x4e3   : > { %v992_v61 = vsub.f32 1.0, %v991_v60 }
 0x4e5   : > { %v993_v62 = vmul.f32 %v1526_v59, %v992_v61 }
 0x4e7   : > { %v994_v63 = vadd.f32 %v1526_v59, %v993_v62 }
 0x4e9   : > { %v1996_v0 = vsel %vm995_vm6, %v1526_v59, %v994_v63 }
 0x4f1   : > { %v940_v48 = vpop.permute.xlu1 %939 }
 0x4f2   : > { %v946_v50 = vsel %vm945_vm5, %v944_v49, %v940_v48 }
 0x4f3   : > { %v947_v51 = vpack.c.bf16 %v946_v50, %v946_v50 }
 0x4f5   : > { %1363 = vmatmul.msk.bf16.vlgmr.msra.gmra.mxu1 %vm626_vm0, %v947_v51 }
 0x572   : > { %v980_v53 = vpop.f32.mrf.mxu1 }
 0x573   : > { %v981_v54 = vadd.f32 %v1502_v52, %v980_v53 }
 0x575   : > { %v984_v55 = vadd.f32 %v981_v54, %v1937_v4 }
 0x577   : > { %v987_v56 = vsel %vm626_vm0, %v984_v55, 0.0 }
 0x578   : > { %988 = vadd.xlane.f32.xlu2 %v987_v56 }
 0x57a   : > { %v982_v57 = vpop.f32.mrf.mxu1 }
 0x5eb   : > { %v989_v1 = vpop.xlane.xlu2 %988 }
 0x5ec   : > { %v997_v2 = vmul.f32 %v1996_v0, %v989_v1 }
 0x5ee   : > { %v998_v3 = vsub.f32 %v984_v55, %v997_v2 }
 0x5f0   : > { %v999_v5 = vmul.f32 %v998_v3, %v998_v3 }
 0x5f2   : > { %v1000_v4 = vsel %vm626_vm0, %v999_v5, 0.0 }
 0x5f3   : > { %1001 = vadd.xlane.f32.xlu0 %v1000_v4 }
 0x666   : > { %v1002_v8 = vpop.xlane.xlu0 %1001 }
 0x667   : > { %v1003_v9 = vmul.f32 %v1002_v8, %v1996_v0 }
 0x669   : > { %v1004_v10 = vadd.f32 1e-12, %v1003_v9  ;;  %v1506_v9 = vld [vmem:[%s2126_s1] ss:$0 sm:$0xff]  ;;  %s1209_s1 = sshll.u32 %s1205_s11, 4  ;;  %s1210_s1 = int_to_ptr.hbm [resolvable:$true] %s1209_s1 }
 0x66a   : > { %s1637_s21 = sshra.s32 %s1210_s1, 4  ;;  %s1638_s21 = int_to_ptr.hbm [resolvable:$true] %s1637_s21 }
 0x66b   : > { %1527 = vrsqrt.f32 %v1004_v10  ;;  %vm1011_vm8 = vweird.f32 %v1004_v10  ;;  %s1639_s12 = scalar_lea.hbm %s1638_s21, 8  ;;  %p1644_p11 = scmp.lt.s32.totalorder %s1638_s21, %s2128_s16 }
 0x66c   : > { %p1640_p1 = scmp.ne.s32.totalorder %s1638_s21, %s1639_s12  ;;  %p1645_p12 = scmp.lt.s32.totalorder %s1643_s25, %s1639_s12 }
 0x66e   : > { %p1641_p9 = pnand %p1640_p1, %p1886_p2  ;;  %p1646_p13 = por %p1645_p12, %p1644_p11 }
 0x670   : > { %p1642_p10 = pneg %p1641_p9 }
 0x671   : > { %v1528_v11 = vpop.eup %1527 }
 0x672   : > { %v1006_v12 = vmul.f32 %v1528_v11, %v1004_v10  ;;  %vm1012_vm7 = vweird.f32 %v1528_v11  ;;  %p1647_p0 = pnand %p1646_p13, %p1642_p10 }
 0x673   : > { %vm1013_vm9 = vmor %vm1011_vm8, %vm1012_vm7 }
 0x674   : > { %v1007_v13 = vmul.f32 %v1528_v11, %v1006_v12 }
 0x676   : > { %v1008_v14 = vmul.f32 0.5, %v1007_v13 }
 0x678   : > { %v1009_v15 = vsub.f32 1.5, %v1008_v14 }
 0x67a   : > { %v1010_v16 = vmul.f32 %v1528_v11, %v1009_v15 }
 0x67c   : > { %v1014_v18 = vsel %vm1013_vm9, %v1528_v11, %v1010_v16 }
 0x67d   : > { %v1015_v20 = vmul.f32 %v1014_v18, %v998_v3 }
 0x67f   : > { %v1019_v21 = vmul.f32 %v1503_v17, %v1015_v20 }
 0x681   : > { %v2007_v22 = vadd.f32 %v1504_v19, %v1019_v21 }
 0x683   : > { %v1024_v23 = vpack.c.bf16 %v2007_v22, %v2007_v22 }
 0x685   : > { %1372 = vmatmul.msk.bf16.vlgmr.msra.gmra.mxu2 %vm626_vm0, %v1024_v23 }
 0x708   : > { %v1057_v25 = vpop.f32.mrf.mxu2 }
 0x709   : > { %v1058_v26 = vadd.f32 %v1505_v24, %v1057_v25 }
 0x70b   : > { %v1062_v27 = vmul.f32 0.70710677, %v1058_v26  ;;  %v1061_v4 = vmul.f32 0.5, %v1058_v26 }
 0x70d   : > { %v1063_v28 = vmul.f32 %v1062_v27, %v1062_v27 }
 0x70f   : > { %v1064_v29 = vmin.f32 %v1063_v28, 16.0 }
 0x710   : > { %v1059_v30 = vpop.f32.mrf.mxu2 }
 0x711   : > { %v1065_v32 = vmul.f32 2.1237322e-06, %v1064_v29  ;;  %v1076_v33 = vmul.f32 3.8918573e-05, %v1064_v29 }
 0x713   : > { %v1066_v34 = vadd.f32 0.00028619796, %v1065_v32  ;;  %v1077_v35 = vadd.f32 0.001143296, %v1076_v33 }
 0x715   : > { %v1067_v37 = vmul.f32 %v1066_v34, %v1064_v29  ;;  %v1078_v38 = vmul.f32 %v1077_v35, %v1064_v29 }
 0x717   : > { %v1079_v39 = vadd.f32 0.014752088, %v1078_v38  ;;  %v1068_v40 = vadd.f32 0.0036580483, %v1067_v37 }
 0x719   : > { %v1080_v42 = vmul.f32 %v1079_v39, %v1064_v29  ;;  %v1069_v44 = vmul.f32 %v1068_v40, %v1064_v29 }
 0x71b   : > { %v1081_v43 = vadd.f32 0.112945676, %v1080_v42  ;;  %v1070_v48 = vadd.f32 0.05243302, %v1069_v44 }
 0x71d   : > { %v1082_v46 = vmul.f32 %v1081_v43, %v1064_v29  ;;  %v1071_v51 = vmul.f32 %v1070_v48, %v1064_v29 }
 0x71f   : > { %v1083_v47 = vadd.f32 0.4994258, %v1082_v46  ;;  %v1072_v52 = vadd.f32 0.18741608, %v1071_v51 }
 0x721   : > { %v1084_v49 = vmul.f32 %v1083_v47, %v1064_v29  ;;  %v1073_v54 = vmul.f32 %v1072_v52, %v1064_v29  ;;  %v1507_v29 = vld [vmem:[%s2127_s17] ss:$0 sm:$0xff] }
 0x723   : > { %v1085_v50 = vadd.f32 1.0, %v1084_v49  ;;  %v1074_v58 = vadd.f32 1.1283791, %v1073_v54 }
 0x725   : > { %1529 = vrcp.f32 %v1085_v50  ;;  %v1097_v57 = vand.u32 2147483648, %v1085_v50  ;;  %v1095_v60 = vand.u32 2147483647, %v1085_v50  ;;  %vm1091_vm11 = vweird.f32 %v1085_v50 }
 0x726   : > { %v1075_v63 = vmul.f32 %v1074_v58, %v1062_v27 }
 0x727   : > { %v1098_v62 = vor.u32 1.1754944e-38, %v1097_v57  ;;  %vm1096_vm13 = vcmp.eq.f32.partialorder %v1095_v60, 8.507059e+37 }
 0x72b   : > { %v1530_v53 = vpop.eup %1529 }
 0x72c   : > { %v1087_v55 = vmul.f32 %v1530_v53, %v1085_v50  ;;  %vm1092_vm10 = vweird.f32 %v1530_v53 }
 0x72d   : > { %vm1093_vm12 = vmor %vm1091_vm11, %vm1092_vm10 }
 0x72e   : > { %v1088_v56 = vsub.f32 1.0, %v1087_v55 }
 0x730   : > { %v1089_v59 = vmul.f32 %v1530_v53, %v1088_v56 }
 0x732   : > { %v1090_v61 = vadd.f32 %v1530_v53, %v1089_v59 }
 0x734   : > { %v1094_v1 = vsel %vm1093_vm12, %v1530_v53, %v1090_v61 }
 0x735   : > { %v1099_v2 = vsel %vm1096_vm13, %v1098_v62, %v1094_v1 }
 0x736   : > { %v1100_v3 = vmul.f32 %v1099_v2, %v1075_v63 }
 0x738   : > { %v1373_v5 = vclamps-f32 %v1100_v3, 1.0 }
 0x73a   : > { %v1103_v6 = vadd.f32 1.0, %v1373_v5 }
 0x73c   : > { %v1104_v7 = vmul.f32 %v1103_v6, %v1061_v4 }
 0x73e   : > { %v1105_v8 = vpack.c.bf16 %v1104_v7, %v1104_v7 }
 0x740   : > { %1390 = vmatmul.msk.bf16.vlgmr.msrb.gmra.mxu3 %vm1142_vm14, %v1105_v8 }
 0x7c3   : > { %v1155_v10 = vpop.f32.mrf.mxu3 }
 0x7c4   : > { %v1156_v11 = vadd.f32 %v1506_v9, %v1155_v10 }
 0x7c6   : > { %v1159_v12 = vadd.f32 %v1156_v11, %v2007_v22 }
 0x7c8   : > { %v1162_v13 = vsel %vm626_vm0, %v1159_v12, 0.0 }
 0x7c9   : > { %1163 = vadd.xlane.f32.xlu1 %v1162_v13 }
 0x7cb   : > { %v1157_v14 = vpop.f32.mrf.mxu3 }
 0x83c   : > { %v1164_v15 = vpop.xlane.xlu1 %1163 }
 0x83d   : > { %v1165_v16 = vmul.f32 %v1164_v15, %v1996_v0 }
 0x83f   : > { %v1166_v17 = vsub.f32 %v1159_v12, %v1165_v16 }
 0x841   : > { %v1167_v18 = vmul.f32 %v1166_v17, %v1166_v17 }
 0x843   : > { %v1168_v19 = vsel %vm626_vm0, %v1167_v18, 0.0 }
 0x844   : > { %1169 = vadd.xlane.f32.xlu2 %v1168_v19 }
 0x8b7   : > { %v1170_v20 = vpop.xlane.xlu2 %1169 }
 0x8b8   : > { %v1171_v21 = vmul.f32 %v1170_v20, %v1996_v0 }
 0x8ba   : > { %v1172_v23 = vadd.f32 1e-12, %v1171_v21 }
 0x8bc   : > { %1531 = vrsqrt.f32 %v1172_v23  ;;  %vm1179_vm1 = vweird.f32 %v1172_v23 }
 0x8c2   : > { %v1532_v22 = vpop.eup %1531 }
 0x8c3   : > { %v1174_v24 = vmul.f32 %v1532_v22, %v1172_v23  ;;  %vm1180_vm15 = vweird.f32 %v1532_v22 }
 0x8c4   : > { %vm1181_vm2 = vmor %vm1179_vm1, %vm1180_vm15 }
 0x8c5   : > { %v1175_v25 = vmul.f32 %v1532_v22, %v1174_v24 }
 0x8c7   : > { %v1176_v26 = vmul.f32 0.5, %v1175_v25 }
 0x8c9   : > { %v1177_v27 = vsub.f32 1.5, %v1176_v26 }
 0x8cb   : > { %v1178_v28 = vmul.f32 %v1532_v22, %v1177_v27 }
 0x8cd   : > { %v1182_v0 = vsel %vm1181_vm2, %v1532_v22, %v1178_v28 }
 0x8ce   : > { %v1183_v30 = vmul.f32 %v1182_v0, %v1166_v17 }
 0x8d0   : > { %v1187_v32 = vmul.f32 %v1507_v29, %v1183_v30 }
 0x8d2   : > { %v1191_v33 = vadd.f32 %v1508_v31, %v1187_v32 }
 0x8d4   : > { %1192 = vst.msk [vmem:[%s594_s24] sm:$0xff] %vm626_vm0, %v1191_v33 }
 0x8d5   : > { %1650 = shalt.err (!%p1647_p0)
}
 0x8d6   : > { %1417 = dma.vmem_to_hbm [thread:$0]  (%p1886_p2), %s1208_s10, 128, %s1210_s1, %s1194_s15  }
 0x8d7 PF: > { %s2130_s20 = sld [smem:[#allocation14_spill]]  ;;  %p1431_p4 = pnand %p1323_p6, %p1893_p5 }
 0x8d9   : > { %p1432_p7 = pneg %p1431_p4 }
 0x8dd   : > { %s1221_s6 = sand.u32 1, %s2130_s20  }
 0x8de   : > { %s1222_s28 = scalar_lea.sflag [#allocation6], %s1221_s6 }
 0x8df   : > { %1684 = dma.done.wait (%p1432_p7), %s1222_s28, 128  }
 0x8e0   : > { %1686 = vsyncadd (%p1432_p7), %s1222_s28, 4294967168  ;;  %s33_s26 = sadd.s32 1, %s1709_s26   ;;  %s2131_s24 = sld [smem:[#allocation15_spill]] }
 0x8e1   : > { %p30_p8 = scmp.ge.s32.totalorder %s33_s26, 4   ;;  %s2132_s25 = sld [smem:[#allocation16_spill]] }
 0x8e2   : > { %s2133_s21 = smov %s1693_s22  ;;  %s2134_s22 = smov %s1697_s23 }
 0x8e3   : > { %s2135_s23 = smov %s1891_s29  ;;  %32 = sbr.rel (!%p30_p8) target bundleno = 16 (0x10), region = 145 }
 0x8e8   :  { %1228 = vsyncpa [#allocation5], 1 }
 0x8e9   :  { %1230 = vsyncpa [#allocation5 + $0x1], 1 }
 0x8ea   :  { %1231 = vsyncpa [#allocation8], 1 }
 0x8eb   :  { %1232 = vsyncpa [#allocation6], 1 }
 0x8ec   :  { %1234 = vsyncpa [#allocation6 + $0x1], 1 }

</bundles_post_ra>
